<compile_context>
chip_gen: v6e
topology: v6e:2x2x1
jax: 0.10.0
libtpu: 0.0.40
codegen_flags: <defaults>
</compile_context>

<pallas_src>
import math
import jax
import jax.numpy as jnp
from jax.experimental import pallas as pl
from jax.experimental.pallas import tpu as pltpu

_SHIFT = math.log(2.0)
_LANES = 512          # lane-dense last dim (multiple of 128)
_SUBLANES = 8


def _shifted_softplus_kernel(x_ref, o_ref):
    # Upcast so exp/log1p run in f32 (v5e EUP has no bf16 path; also better accuracy).
    x = x_ref[...].astype(jnp.float32)
    # Numerically-stable softplus: max(x, 0) + log1p(exp(-|x|)).
    sp = jnp.maximum(x, 0.0) + jnp.log1p(jnp.exp(-jnp.abs(x)))
    o_ref[...] = (sp - _SHIFT).astype(o_ref.dtype)


def shifted_softplus(x: jax.Array, *, row_tile: int = 1024) -> jax.Array:
    """Applies softplus(x) - log(2) elementwise. Accepts any shape / float dtype."""
    orig_shape = x.shape
    orig_dtype = x.dtype

    flat = x.reshape(-1)
    n = flat.shape[0]

    # Pad only up to the minimum (8, 512) tile granularity.
    min_chunk = _SUBLANES * _LANES
    n_pad = pl.cdiv(n, min_chunk) * min_chunk
    padded = n_pad != n
    if padded:
        flat = jnp.pad(flat, (0, n_pad - n))

    rows = n_pad // _LANES          # always a multiple of 8

    # Pick the row tile: big blocks for large inputs, and split medium inputs
    # into >= 2 grid steps so both v7x TensorCores get work.
    if rows <= row_tile:
        if rows >= 2 * _SUBLANES:
            rt = ((rows + 1) // 2 + _SUBLANES - 1) // _SUBLANES * _SUBLANES
        else:
            rt = rows
    else:
        rt = row_tile

    x2d = flat.reshape(rows, _LANES)
    grid = (pl.cdiv(rows, rt),)     # partial last block handled by Pallas

    out2d = pl.pallas_call(
        _shifted_softplus_kernel,
        out_shape=jax.ShapeDtypeStruct((rows, _LANES), orig_dtype),
        grid=grid,
        in_specs=[pl.BlockSpec((rt, _LANES), lambda i: (i, 0))],
        out_specs=pl.BlockSpec((rt, _LANES), lambda i: (i, 0)),
        compiler_params=pltpu.CompilerParams(
            dimension_semantics=("parallel",),
            vmem_limit_bytes=32 * 1024 * 1024,
        ),
    )(x2d)

    out_flat = out2d.reshape(-1)
    if padded:
        out_flat = out_flat[:n]
    return out_flat.reshape(orig_shape)


if __name__ == "__main__":
    key = jax.random.PRNGKey(0)

    # NCHW input, consistent with how this activation is used inside conv nets.
    x = jax.random.normal(key, (2, 4, 16, 16), dtype=jnp.float32) * 3.0
    y = jax.block_until_ready(shifted_softplus(x))
    y_ref = jax.nn.softplus(x) - _SHIFT
    assert y.shape == x.shape and y.dtype == x.dtype
    assert jnp.max(jnp.abs(y - y_ref)) < 1e-5

    # Misaligned size exercises the pad + partial path.
    x2 = jax.random.normal(jax.random.PRNGKey(1), (3, 5, 7), dtype=jnp.float32) * 3.0
    y2 = jax.block_until_ready(shifted_softplus(x2))
    y2_ref = jax.nn.softplus(x2) - _SHIFT
    assert y2.shape == x2.shape and jnp.max(jnp.abs(y2 - y2_ref)) < 1e-5

    print("KERNEL_OK")
</pallas_src>

<mosaic_0001>
module attributes {stable_mosaic.version = 11 : i64} {
  func.func @_shifted_softplus_kernel(%arg0: i32, %arg1: memref<8x512xf32, #tpu.memory_space<vmem>>, %arg2: memref<8x512xf32, #tpu.memory_space<vmem>>) attributes {dimension_semantics = [#tpu.dimension_semantics<parallel>], iteration_bounds = array<i64: 1>, scalar_prefetch = 0 : i64, scratch_operands = 0 : i64, tpu.core_type = #tpu.core_type<tc>, window_params = [{transform_indices = @transform_0, window_bounds = array<i64: 8, 512>}, {transform_indices = @transform_1, window_bounds = array<i64: 8, 512>}]} {
    %c0 = arith.constant 0 : index
    %c0_0 = arith.constant 0 : index
    %0 = vector.load %arg1[%c0, %c0_0] : memref<8x512xf32, #tpu.memory_space<vmem>>, vector<8x512xf32>
    %cst = arith.constant 0.000000e+00 : f32
    %1 = vector.broadcast %cst : f32 to vector<8x512xf32>
    %2 = arith.maximumf %0, %1 : vector<8x512xf32>
    %3 = math.absf %0 : vector<8x512xf32>
    %cst_1 = arith.constant 0.000000e+00 : f32
    %4 = vector.broadcast %cst_1 : f32 to vector<8x512xf32>
    %5 = arith.subf %4, %3 : vector<8x512xf32>
    %6 = math.exp %5 : vector<8x512xf32>
    %7 = math.log1p %6 : vector<8x512xf32>
    %8 = arith.addf %2, %7 : vector<8x512xf32>
    %cst_2 = arith.constant 0.693147182 : f32
    %9 = vector.broadcast %cst_2 : f32 to vector<8x512xf32>
    %10 = arith.subf %8, %9 : vector<8x512xf32>
    %c0_3 = arith.constant 0 : index
    %c0_4 = arith.constant 0 : index
    %11 = vector.load %arg2[%c0_3, %c0_4] : memref<8x512xf32, #tpu.memory_space<vmem>>, vector<8x512xf32>
    tpu.vector_store %arg2[%c0_3, %c0_4], %10 {strides = array<i32>} : memref<8x512xf32, #tpu.memory_space<vmem>>, vector<8x512xf32>,
    return
  }
  func.func @transform_0(%arg0: i32) -> (i32, i32) {
    %c0_i32 = arith.constant 0 : i32
    %c0_i32_0 = arith.constant 0 : i32
    return %arg0, %c0_i32 : i32, i32
  }
  func.func @transform_1(%arg0: i32) -> (i32, i32) {
    %c0_i32 = arith.constant 0 : i32
    %c0_i32_0 = arith.constant 0 : i32
    return %arg0, %c0_i32 : i32, i32
  }
}

</mosaic_0001>

<bundles_post_ra>
// kernel: tpu_custom_call.1
= control target key start
LH: loop header
LB: loop body
LE: loop exit
PB: predicated region body
PF: predicated region fallthrough
CT: control target
= control target key end

     0   :  { %6 = vsyncpa [#allocation3], 0  ;;  %s214_s0 = inlined_call_operand.hbm [shape: f32[8,512], index: 0, kind: input, shape index: {}]   ;;  %s215_s1 = inlined_call_operand.hbm [shape: f32[8,512], index: 1, kind: output, shape index: {}]  }
   0x1   :  { %7 = vsyncpa [#allocation4], 0  ;;  %s174_s6 = smov [#allocation2]  }
   0x2   :  { %s14_s7 = sshll.u32 %s174_s6, 4  ;;  %s15_s7 = int_to_ptr.vmem [resolvable:$true] %s14_s7 }
   0x3   :  { %s138_s8 = scalar_lea.vmem %s15_s7, 512  ;;  %p143_p1 = scmp.lt.s32.totalorder %s15_s7, %s15_s7 }
   0x4   :  { %p139_p0 = scmp.ne.s32.totalorder %s15_s7, %s138_s8  ;;  %p144_p2 = scmp.lt.s32.totalorder %s138_s8, %s138_s8 }
   0x6   :  { %p145_p3 = por %p144_p2, %p143_p1 }
   0x8   :  { %p146_p4 = pnand %p145_p3, %p139_p0 }
   0xa   :  { %149 = shalt.err (!%p146_p4)
}
   0xb   :  { %17 = dma.hbm_to_vmem [thread:$0]  %s214_s0, 512, %s15_s7, [#allocation3]  }
   0xc   :  { %170 = dma.done.wait [#allocation3], 512  }
   0xd   :  { %171 = vsyncadd [#allocation3], 4294966784  ;;  %v189_v0 = vld [vmem:[#allocation2] sm:$0xff]  ;;  %v191_v1 = vld [vmem:[#allocation2 + $0x8] sm:$0xff]  ;;  %s175_s0 = smov [#allocation5]  }
   0xe   :  { %v193_v2 = vld [vmem:[#allocation2 + $0x10] sm:$0xff]  ;;  %v29_v3 = vand.u32 2147483647, %v189_v0  ;;  %v30_v4 = vand.u32 2147483647, %v191_v1  ;;  %v198_v6 = vld [vmem:[#allocation2 + $0x18] sm:$0xff] }
   0xf   :  { %v31_v5 = vand.u32 2147483647, %v193_v2  ;;  %v32_v9 = vand.u32 2147483647, %v198_v6  ;;  %v25_v37 = vmax.f32 %v189_v0, 0.0  ;;  %v26_v43 = vmax.f32 %v191_v1, 0.0 }
  0x10   :  { %v33_v7 = vsub.f32 0.0, %v29_v3  ;;  %v34_v8 = vsub.f32 0.0, %v30_v4  ;;  %v27_v47 = vmax.f32 %v193_v2, 0.0  ;;  %v28_v54 = vmax.f32 %v198_v6, 0.0  ;;  %s99_s11 = sshll.u32 %s175_s0, 4  ;;  %s100_s11 = int_to_ptr.vmem [resolvable:$true] %s99_s11 }
  0x11   :  { %v35_v10 = vsub.f32 0.0, %v31_v5  ;;  %v36_v13 = vsub.f32 0.0, %v32_v9  ;;  %s150_s12 = scalar_lea.vmem %s100_s11, 512  ;;  %p155_p6 = scmp.lt.s32.totalorder %s100_s11, %s100_s11 }
  0x12   :  { %v37_v11 = vmul.f32 1.442695, %v33_v7  ;;  %v39_v12 = vmul.f32 1.442695, %v34_v8  ;;  %p151_p5 = scmp.ne.s32.totalorder %s100_s11, %s150_s12  ;;  %p156_p7 = scmp.lt.s32.totalorder %s150_s12, %s150_s12 }
  0x13   :  { %v41_v14 = vmul.f32 1.442695, %v35_v10  ;;  %v43_v15 = vmul.f32 1.442695, %v36_v13 }
  0x14   :  { %114 = vpow2.f32 %v37_v11  ;;  %p157_p8 = por %p156_p7, %p155_p6 }
  0x15   :  { %116 = vpow2.f32 %v39_v12 }
  0x16   :  { %118 = vpow2.f32 %v41_v14  ;;  %p158_p9 = pnand %p157_p8, %p151_p5 }
  0x17   :  { %120 = vpow2.f32 %v43_v15 }
  0x21   :  { %v115_v16 = vpop.eup %114 }
  0x22   :  { %v117_v17 = vpop.eup %116  ;;  %v45_v18 = vadd.f32 1.0, %v115_v16  ;;  %v48_v24 = vmul.f32 -0.5, %v115_v16  ;;  %v51_v29 = vand.u32 2147483647, %v115_v16 }
  0x23   :  { %v119_v19 = vpop.eup %118  ;;  %v54_v20 = vadd.f32 1.0, %v117_v17  ;;  %v57_v25 = vmul.f32 -0.5, %v117_v17  ;;  %v60_v31 = vand.u32 2147483647, %v117_v17 }
  0x24   :  { %v121_v21 = vpop.eup %120  ;;  %122 = vlog2.f32 %v45_v18  ;;  %v63_v22 = vadd.f32 1.0, %v119_v19  ;;  %v66_v26 = vmul.f32 -0.5, %v119_v19  ;;  %v49_v27 = vadd.f32 1.0, %v48_v24 }
  0x25   :  { %124 = vlog2.f32 %v54_v20  ;;  %v72_v23 = vadd.f32 1.0, %v121_v21  ;;  %v75_v28 = vmul.f32 -0.5, %v121_v21  ;;  %v58_v30 = vadd.f32 1.0, %v57_v25 }
  0x26   :  { %126 = vlog2.f32 %v63_v22  ;;  %v67_v32 = vadd.f32 1.0, %v66_v26  ;;  %v69_v33 = vand.u32 2147483647, %v119_v19  ;;  %v50_v34 = vmul.f32 %v115_v16, %v49_v27 }
  0x27   :  { %128 = vlog2.f32 %v72_v23  ;;  %v76_v35 = vadd.f32 1.0, %v75_v28  ;;  %vm202_vm0 = vcmp.lt.f32.partialorder %v51_v29, 0.0004427343  ;;  %v59_v39 = vmul.f32 %v117_v17, %v58_v30 }
  0x28   :  { %v78_v40 = vand.u32 2147483647, %v121_v21  ;;  %vm61_vm1 = vcmp.lt.f32.partialorder %v60_v31, 0.0004427343  ;;  %v68_v44 = vmul.f32 %v119_v19, %v67_v32  ;;  %vm70_vm2 = vcmp.lt.f32.partialorder %v69_v33, 0.0004427343 }
  0x29   :  { %v77_v50 = vmul.f32 %v121_v21, %v76_v35 }
  0x2a   :  { %vm79_vm3 = vcmp.lt.f32.partialorder %v78_v40, 0.0004427343 }
  0x31   :  { %v123_v36 = vpop.eup %122 }
  0x32   :  { %v125_v41 = vpop.eup %124  ;;  %v47_v42 = vmul.f32 0.6931472, %v123_v36 }
  0x33   :  { %v127_v45 = vpop.eup %126  ;;  %v56_v46 = vmul.f32 0.6931472, %v125_v41 }
  0x34   :  { %v53_v48 = vsel %vm202_vm0, %v50_v34, %v47_v42  ;;  %v65_v49 = vmul.f32 0.6931472, %v127_v45  ;;  %v129_v51 = vpop.eup %128 }
  0x35   :  { %v81_v52 = vadd.f32 %v53_v48, %v25_v37  ;;  %v62_v53 = vsel %vm61_vm1, %v59_v39, %v56_v46  ;;  %v74_v57 = vmul.f32 0.6931472, %v129_v51 }
  0x36   :  { %v82_v55 = vadd.f32 %v62_v53, %v26_v43  ;;  %v71_v56 = vsel %vm70_vm2, %v68_v44, %v65_v49 }
  0x37   :  { %v108_v58 = vadd.f32 -0.6931472, %v81_v52  ;;  %v83_v59 = vadd.f32 %v71_v56, %v27_v47  ;;  %v80_v61 = vsel %vm79_vm3, %v77_v50, %v74_v57 }
  0x38   :  { %v109_v60 = vadd.f32 -0.6931472, %v82_v55  ;;  %v84_v63 = vadd.f32 %v80_v61, %v28_v54 }
  0x39   :  { %89 = vst [vmem:[#allocation5] sm:$0xff] %v108_v58  ;;  %v110_v62 = vadd.f32 -0.6931472, %v83_v59 }
  0x3a   :  { %90 = vst [vmem:[#allocation5 + $0x8] sm:$0xff] %v109_v60  ;;  %v111_v0 = vadd.f32 -0.6931472, %v84_v63 }
  0x3b   :  { %91 = vst [vmem:[#allocation5 + $0x10] sm:$0xff] %v110_v62 }
  0x3c   :  { %92 = vst [vmem:[#allocation5 + $0x18] sm:$0xff] %v111_v0 }
  0x3d   :  { %161 = shalt.err (!%p158_p9)
}
  0x3e   :  { %102 = dma.vmem_to_hbm [thread:$0]  %s100_s11, 512, %s215_s1, [#allocation4]  }
  0x3f   :  { %172 = dma.done.wait [#allocation4], 512  }
  0x40   :  { %173 = vsyncadd [#allocation4], 4294966784 }
  0x41   :  { %106 = vsyncpa [#allocation3], 1 }
  0x42   :  { %107 = vsyncpa [#allocation4], 1 }

</bundles_post_ra>
